<compile_context>
chip_gen: v7x
topology: tpu7x:2x2x1
jax: 0.10.0
libtpu: 0.0.40
codegen_flags: <defaults>
</compile_context>

<pallas_src>
import jax
import jax.numpy as jnp
from jax.experimental import pallas as pl
from jax.experimental.pallas import tpu as pltpu

# ---- module constants (from the PyTorch source) -----------------------------
LETTER = [c for c in "SE?abcdefghijklmnopqrstuvwxyz"]
N_CLASS = len(LETTER)          # 29
N_HIDDEN = 128
N_OUT_PAD = 128                # lane-dense fc output (sliced to 29 in wrapper)


# ---- Pallas kernel -----------------------------------------------------------
def _seq2seq_kernel(enc_pre_ref, dec_pre_ref, h0_ref,
                    e_whh_ref, d_whh_ref,
                    fc_w_ref, fc_b_ref,
                    out_ref):
    """Encoder + decoder recurrence + fc projection for one (padded) batch.

    enc_pre_ref / dec_pre_ref : [T*B_pad, 128]  precomputed x@W_ih^T + biases
    h0_ref                    : [B_pad, 128]
    e_whh_ref / d_whh_ref     : [128, 128] bf16 (pre-transposed)
    fc_w_ref                  : [128, 128] f32 (lane-padded), fc_b_ref [1,128]
    out_ref                   : [T_dec*B_pad, 128]
    """
    b = h0_ref.shape[0]
    t_enc = enc_pre_ref.shape[0] // b
    t_dec = dec_pre_ref.shape[0] // b

    # TODO(synk): the serial h @ Whh chain could be made weight-stationary on
    # the MXU via pltpu.matmul_push_rhs / matmul_acc_lhs / matmul_pop; kept on
    # jnp.dot (bf16 operands, f32 accumulation) for portability/correctness.

    # ---- encoder: h_t = tanh(pre_t + h_{t-1} @ Whh^T) -----------------------
    e_whh = e_whh_ref[...]                                   # bf16, ~8 vregs
    h = h0_ref[...]                                          # f32 [b, 128]
    for t in range(t_enc):                                   # static -> unrolled
        hh = jnp.dot(h.astype(jnp.bfloat16), e_whh,
                     preferred_element_type=jnp.float32)
        h = jnp.tanh(enc_pre_ref[t * b:(t + 1) * b, :] + hh)

    # ---- decoder (init from encoder final state); states stay in vregs -----
    d_whh = d_whh_ref[...]
    hs = []
    for t in range(t_dec):
        hh = jnp.dot(h.astype(jnp.bfloat16), d_whh,
                     preferred_element_type=jnp.float32)
        h = jnp.tanh(dec_pre_ref[t * b:(t + 1) * b, :] + hh)
        hs.append(h)
    h_all = jnp.concatenate(hs, axis=0)                      # [t_dec*b, 128] f32

    # ---- one batched fc projection + single lane-dense store ---------------
    logits = (jnp.dot(h_all, fc_w_ref[...],
                      preferred_element_type=jnp.float32)
              + fc_b_ref[...])                               # [t_dec*b, 128]
    out_ref[...] = logits.astype(out_ref.dtype)


# ---- one-time weight preparation (hoisted out of the per-call path) ----------
def prepare_params(params):
    fc_w = jnp.zeros((N_HIDDEN, N_OUT_PAD), jnp.float32).at[:, :N_CLASS].set(
        params["fc_w"].T.astype(jnp.float32))
    fc_b = jnp.zeros((1, N_OUT_PAD), jnp.float32).at[:, :N_CLASS].set(
        params["fc_b"].reshape(1, N_CLASS).astype(jnp.float32))
    return {
        "e_wih": params["enc_w_ih"].T.astype(jnp.float32),     # [29, 128]
        "e_whh": params["enc_w_hh"].T.astype(jnp.bfloat16),    # [128, 128]
        "e_b": (params["enc_b_ih"] + params["enc_b_hh"]
                ).reshape(1, N_HIDDEN).astype(jnp.float32),
        "d_wih": params["dec_w_ih"].T.astype(jnp.float32),
        "d_whh": params["dec_w_hh"].T.astype(jnp.bfloat16),
        "d_b": (params["dec_b_ih"] + params["dec_b_hh"]
                ).reshape(1, N_HIDDEN).astype(jnp.float32),
        "fc_w": fc_w,
        "fc_b": fc_b,
    }


# ---- per-call wrapper ---------------------------------------------------------
@jax.jit
def seq2seq_forward(prep, enc_input, enc_hidden, dec_input):
    """Mirrors Seq2Seq.forward.

    enc_input : [B, T_enc, n_class]
    enc_hidden: [1, B, n_hidden]
    dec_input : [B, T_dec, n_class]
    returns   : [T_dec, B, n_class]
    """
    # transpose(0, 1) -> time-major
    enc_x = jnp.transpose(enc_input, (1, 0, 2)).astype(jnp.float32)
    dec_x = jnp.transpose(dec_input, (1, 0, 2)).astype(jnp.float32)
    h0 = enc_hidden[0].astype(jnp.float32)                    # [B, n_hidden]

    t_enc, b, n_class = enc_x.shape
    t_dec = dec_x.shape[0]

    # Pad batch to the f32 sublane tile (8) so vregs / MXU rows are filled.
    b_pad = max(8, ((b + 7) // 8) * 8)
    if b_pad != b:
        pad3 = ((0, 0), (0, b_pad - b), (0, 0))
        enc_x = jnp.pad(enc_x, pad3)
        dec_x = jnp.pad(dec_x, pad3)
        h0 = jnp.pad(h0, ((0, b_pad - b), (0, 0)))

    # Input projections (off the serial recurrence path) done in XLA so the
    # 29-lane, non-tile-aligned arrays never enter the kernel.
    enc_pre = enc_x.reshape(t_enc * b_pad, n_class) @ prep["e_wih"] + prep["e_b"]
    dec_pre = dec_x.reshape(t_dec * b_pad, n_class) @ prep["d_wih"] + prep["d_b"]

    vmem = pl.BlockSpec(memory_space=pltpu.MemorySpace.VMEM)
    out = pl.pallas_call(
        _seq2seq_kernel,
        out_shape=jax.ShapeDtypeStruct((t_dec * b_pad, N_OUT_PAD), jnp.float32),
        in_specs=[vmem] * 7,
        out_specs=vmem,
    )(enc_pre, dec_pre, h0,
      prep["e_whh"], prep["d_whh"],
      prep["fc_w"], prep["fc_b"])

    # Undo padding: [T_dec*B_pad, 128] -> [T_dec, B, n_class]
    return out.reshape(t_dec, b_pad, N_OUT_PAD)[:, :b, :N_CLASS]


# ---- pure-JAX f32 reference (for correctness check) ---------------------------
def seq2seq_reference(params, enc_input, enc_hidden, dec_input):
    enc_x = jnp.transpose(enc_input, (1, 0, 2)).astype(jnp.float32)
    dec_x = jnp.transpose(dec_input, (1, 0, 2)).astype(jnp.float32)
    h = enc_hidden[0].astype(jnp.float32)

    def rnn_cell(x, h, w_ih, w_hh, b_ih, b_hh):
        return jnp.tanh(x @ w_ih.T + b_ih + h @ w_hh.T + b_hh)

    for t in range(enc_x.shape[0]):
        h = rnn_cell(enc_x[t], h, params["enc_w_ih"], params["enc_w_hh"],
                     params["enc_b_ih"], params["enc_b_hh"])
    outs = []
    for t in range(dec_x.shape[0]):
        h = rnn_cell(dec_x[t], h, params["dec_w_ih"], params["dec_w_hh"],
                     params["dec_b_ih"], params["dec_b_hh"])
        outs.append(h @ params["fc_w"].T + params["fc_b"])
    return jnp.stack(outs, axis=0)


# ---- deterministic parameter init (matches nn.RNN / nn.Linear shapes) ---------
def init_params(key):
    ks = jax.random.split(key, 11)
    s_rnn = 1.0 / jnp.sqrt(N_HIDDEN)
    s_fc = 1.0 / jnp.sqrt(N_HIDDEN)
    u = lambda k, shape, s: jax.random.uniform(k, shape, jnp.float32, -s, s)
    return {
        "enc_w_ih": u(ks[0], (N_HIDDEN, N_CLASS), s_rnn),
        "enc_w_hh": u(ks[1], (N_HIDDEN, N_HIDDEN), s_rnn),
        "enc_b_ih": u(ks[2], (N_HIDDEN,), s_rnn),
        "enc_b_hh": u(ks[3], (N_HIDDEN,), s_rnn),
        "dec_w_ih": u(ks[4], (N_HIDDEN, N_CLASS), s_rnn),
        "dec_w_hh": u(ks[5], (N_HIDDEN, N_HIDDEN), s_rnn),
        "dec_b_ih": u(ks[6], (N_HIDDEN,), s_rnn),
        "dec_b_hh": u(ks[7], (N_HIDDEN,), s_rnn),
        "fc_w": u(ks[8], (N_CLASS, N_HIDDEN), s_fc),
        "fc_b": u(ks[9], (N_CLASS,), s_fc),
    }
    # TODO(synk): nn.RNN(dropout=0.5) with num_layers=1 has no effect on the
    # forward pass (dropout only applies between stacked layers), so it is
    # intentionally omitted.


if __name__ == "__main__":
    key = jax.random.PRNGKey(0)
    pkey, k1, k2, k3 = jax.random.split(key, 4)
    params = init_params(pkey)
    prep = prepare_params(params)              # one-time weight prep

    B, T_ENC, T_DEC = 2, 8, 8
    # one-hot inputs, as the original model feeds one-hot letter encodings
    enc_ids = jax.random.randint(k1, (B, T_ENC), 0, N_CLASS)
    dec_ids = jax.random.randint(k2, (B, T_DEC), 0, N_CLASS)
    enc_input = jax.nn.one_hot(enc_ids, N_CLASS, dtype=jnp.float32)   # [B, T_enc, 29]
    dec_input = jax.nn.one_hot(dec_ids, N_CLASS, dtype=jnp.float32)   # [B, T_dec, 29]
    enc_hidden = jnp.zeros((1, B, N_HIDDEN), jnp.float32)             # [1, B, 128]

    out = seq2seq_forward(prep, enc_input, enc_hidden, dec_input)
    out = jax.block_until_ready(out)

    ref = seq2seq_reference(params, enc_input, enc_hidden, dec_input)
    assert out.shape == (T_DEC, B, N_CLASS), out.shape
    # Tolerance loosened vs the pure-f32 reference: the recurrence matmuls use
    # bf16 operands (f32 accumulation) and the input/fc projections are
    # reassociated; |h| <= 1 via tanh keeps the bf16 error small.
    assert jnp.allclose(out, ref, atol=5e-2, rtol=5e-2), "mismatch vs reference"

    print("KERNEL_OK")
</pallas_src>

<mosaic_0001>
module attributes {stable_mosaic.version = 11 : i64} {
  func.func @_seq2seq_kernel(%arg0: memref<64x128xf32, #tpu.memory_space<vmem>>, %arg1: memref<64x128xf32, #tpu.memory_space<vmem>>, %arg2: memref<8x128xf32, #tpu.memory_space<vmem>>, %arg3: memref<128x128xbf16, #tpu.memory_space<vmem>>, %arg4: memref<128x128xbf16, #tpu.memory_space<vmem>>, %arg5: memref<128x128xf32, #tpu.memory_space<vmem>>, %arg6: memref<1x128xf32, #tpu.memory_space<vmem>>, %arg7: memref<64x128xf32, #tpu.memory_space<vmem>>) attributes {dimension_semantics = [], scalar_prefetch = 0 : i64, scratch_operands = 0 : i64, tpu.core_type = #tpu.core_type<tc>} {
    %c0 = arith.constant 0 : index
    %c0_0 = arith.constant 0 : index
    %0 = vector.load %arg3[%c0, %c0_0] : memref<128x128xbf16, #tpu.memory_space<vmem>>, vector<128x128xbf16>
    %c0_1 = arith.constant 0 : index
    %c0_2 = arith.constant 0 : index
    %1 = vector.load %arg2[%c0_1, %c0_2] : memref<8x128xf32, #tpu.memory_space<vmem>>, vector<8x128xf32>
    %2 = arith.truncf %1 : vector<8x128xf32> to vector<8x128xbf16>
    %cst = arith.constant dense<0.000000e+00> : vector<8x128xf32>
    %3 = tpu.matmul %2, %0, %cst {dimension_numbers = #tpu.dot_dimension_numbers<[1], [0], [0], [1], [0, 0, 1, 1], [], []>} : vector<8x128xbf16>, vector<128x128xbf16>, vector<8x128xf32> -> vector<8x128xf32>
    %c0_3 = arith.constant 0 : index
    %c0_4 = arith.constant 0 : index
    %4 = vector.load %arg0[%c0_3, %c0_4] : memref<64x128xf32, #tpu.memory_space<vmem>>, vector<8x128xf32>
    %5 = arith.addf %4, %3 : vector<8x128xf32>
    %6 = math.tanh %5 : vector<8x128xf32>
    %7 = arith.truncf %6 : vector<8x128xf32> to vector<8x128xbf16>
    %cst_5 = arith.constant dense<0.000000e+00> : vector<8x128xf32>
    %8 = tpu.matmul %7, %0, %cst_5 {dimension_numbers = #tpu.dot_dimension_numbers<[1], [0], [0], [1], [0, 0, 1, 1], [], []>} : vector<8x128xbf16>, vector<128x128xbf16>, vector<8x128xf32> -> vector<8x128xf32>
    %c8 = arith.constant 8 : index
    %c0_6 = arith.constant 0 : index
    %9 = vector.load %arg0[%c8, %c0_6] : memref<64x128xf32, #tpu.memory_space<vmem>>, vector<8x128xf32>
    %10 = arith.addf %9, %8 : vector<8x128xf32>
    %11 = math.tanh %10 : vector<8x128xf32>
    %12 = arith.truncf %11 : vector<8x128xf32> to vector<8x128xbf16>
    %cst_7 = arith.constant dense<0.000000e+00> : vector<8x128xf32>
    %13 = tpu.matmul %12, %0, %cst_7 {dimension_numbers = #tpu.dot_dimension_numbers<[1], [0], [0], [1], [0, 0, 1, 1], [], []>} : vector<8x128xbf16>, vector<128x128xbf16>, vector<8x128xf32> -> vector<8x128xf32>
    %c16 = arith.constant 16 : index
    %c0_8 = arith.constant 0 : index
    %14 = vector.load %arg0[%c16, %c0_8] : memref<64x128xf32, #tpu.memory_space<vmem>>, vector<8x128xf32>
    %15 = arith.addf %14, %13 : vector<8x128xf32>
    %16 = math.tanh %15 : vector<8x128xf32>
    %17 = arith.truncf %16 : vector<8x128xf32> to vector<8x128xbf16>
    %cst_9 = arith.constant dense<0.000000e+00> : vector<8x128xf32>
    %18 = tpu.matmul %17, %0, %cst_9 {dimension_numbers = #tpu.dot_dimension_numbers<[1], [0], [0], [1], [0, 0, 1, 1], [], []>} : vector<8x128xbf16>, vector<128x128xbf16>, vector<8x128xf32> -> vector<8x128xf32>
    %c24 = arith.constant 24 : index
    %c0_10 = arith.constant 0 : index
    %19 = vector.load %arg0[%c24, %c0_10] : memref<64x128xf32, #tpu.memory_space<vmem>>, vector<8x128xf32>
    %20 = arith.addf %19, %18 : vector<8x128xf32>
    %21 = math.tanh %20 : vector<8x128xf32>
    %22 = arith.truncf %21 : vector<8x128xf32> to vector<8x128xbf16>
    %cst_11 = arith.constant dense<0.000000e+00> : vector<8x128xf32>
    %23 = tpu.matmul %22, %0, %cst_11 {dimension_numbers = #tpu.dot_dimension_numbers<[1], [0], [0], [1], [0, 0, 1, 1], [], []>} : vector<8x128xbf16>, vector<128x128xbf16>, vector<8x128xf32> -> vector<8x128xf32>
    %c32 = arith.constant 32 : index
    %c0_12 = arith.constant 0 : index
    %24 = vector.load %arg0[%c32, %c0_12] : memref<64x128xf32, #tpu.memory_space<vmem>>, vector<8x128xf32>
    %25 = arith.addf %24, %23 : vector<8x128xf32>
    %26 = math.tanh %25 : vector<8x128xf32>
    %27 = arith.truncf %26 : vector<8x128xf32> to vector<8x128xbf16>
    %cst_13 = arith.constant dense<0.000000e+00> : vector<8x128xf32>
    %28 = tpu.matmul %27, %0, %cst_13 {dimension_numbers = #tpu.dot_dimension_numbers<[1], [0], [0], [1], [0, 0, 1, 1], [], []>} : vector<8x128xbf16>, vector<128x128xbf16>, vector<8x128xf32> -> vector<8x128xf32>
    %c40 = arith.constant 40 : index
    %c0_14 = arith.constant 0 : index
    %29 = vector.load %arg0[%c40, %c0_14] : memref<64x128xf32, #tpu.memory_space<vmem>>, vector<8x128xf32>
    %30 = arith.addf %29, %28 : vector<8x128xf32>
    %31 = math.tanh %30 : vector<8x128xf32>
    %32 = arith.truncf %31 : vector<8x128xf32> to vector<8x128xbf16>
    %cst_15 = arith.constant dense<0.000000e+00> : vector<8x128xf32>
    %33 = tpu.matmul %32, %0, %cst_15 {dimension_numbers = #tpu.dot_dimension_numbers<[1], [0], [0], [1], [0, 0, 1, 1], [], []>} : vector<8x128xbf16>, vector<128x128xbf16>, vector<8x128xf32> -> vector<8x128xf32>
    %c48 = arith.constant 48 : index
    %c0_16 = arith.constant 0 : index
    %34 = vector.load %arg0[%c48, %c0_16] : memref<64x128xf32, #tpu.memory_space<vmem>>, vector<8x128xf32>
    %35 = arith.addf %34, %33 : vector<8x128xf32>
    %36 = math.tanh %35 : vector<8x128xf32>
    %37 = arith.truncf %36 : vector<8x128xf32> to vector<8x128xbf16>
    %cst_17 = arith.constant dense<0.000000e+00> : vector<8x128xf32>
    %38 = tpu.matmul %37, %0, %cst_17 {dimension_numbers = #tpu.dot_dimension_numbers<[1], [0], [0], [1], [0, 0, 1, 1], [], []>} : vector<8x128xbf16>, vector<128x128xbf16>, vector<8x128xf32> -> vector<8x128xf32>
    %c56 = arith.constant 56 : index
    %c0_18 = arith.constant 0 : index
    %39 = vector.load %arg0[%c56, %c0_18] : memref<64x128xf32, #tpu.memory_space<vmem>>, vector<8x128xf32>
    %40 = arith.addf %39, %38 : vector<8x128xf32>
    %41 = math.tanh %40 : vector<8x128xf32>
    %c0_19 = arith.constant 0 : index
    %c0_20 = arith.constant 0 : index
    %42 = vector.load %arg4[%c0_19, %c0_20] : memref<128x128xbf16, #tpu.memory_space<vmem>>, vector<128x128xbf16>
    %43 = arith.truncf %41 : vector<8x128xf32> to vector<8x128xbf16>
    %cst_21 = arith.constant dense<0.000000e+00> : vector<8x128xf32>
    %44 = tpu.matmul %43, %42, %cst_21 {dimension_numbers = #tpu.dot_dimension_numbers<[1], [0], [0], [1], [0, 0, 1, 1], [], []>} : vector<8x128xbf16>, vector<128x128xbf16>, vector<8x128xf32> -> vector<8x128xf32>
    %c0_22 = arith.constant 0 : index
    %c0_23 = arith.constant 0 : index
    %45 = vector.load %arg1[%c0_22, %c0_23] : memref<64x128xf32, #tpu.memory_space<vmem>>, vector<8x128xf32>
    %46 = arith.addf %45, %44 : vector<8x128xf32>
    %47 = math.tanh %46 : vector<8x128xf32>
    %48 = arith.truncf %47 : vector<8x128xf32> to vector<8x128xbf16>
    %cst_24 = arith.constant dense<0.000000e+00> : vector<8x128xf32>
    %49 = tpu.matmul %48, %42, %cst_24 {dimension_numbers = #tpu.dot_dimension_numbers<[1], [0], [0], [1], [0, 0, 1, 1], [], []>} : vector<8x128xbf16>, vector<128x128xbf16>, vector<8x128xf32> -> vector<8x128xf32>
    %c8_25 = arith.constant 8 : index
    %c0_26 = arith.constant 0 : index
    %50 = vector.load %arg1[%c8_25, %c0_26] : memref<64x128xf32, #tpu.memory_space<vmem>>, vector<8x128xf32>
    %51 = arith.addf %50, %49 : vector<8x128xf32>
    %52 = math.tanh %51 : vector<8x128xf32>
    %53 = arith.truncf %52 : vector<8x128xf32> to vector<8x128xbf16>
    %cst_27 = arith.constant dense<0.000000e+00> : vector<8x128xf32>
    %54 = tpu.matmul %53, %42, %cst_27 {dimension_numbers = #tpu.dot_dimension_numbers<[1], [0], [0], [1], [0, 0, 1, 1], [], []>} : vector<8x128xbf16>, vector<128x128xbf16>, vector<8x128xf32> -> vector<8x128xf32>
    %c16_28 = arith.constant 16 : index
    %c0_29 = arith.constant 0 : index
    %55 = vector.load %arg1[%c16_28, %c0_29] : memref<64x128xf32, #tpu.memory_space<vmem>>, vector<8x128xf32>
    %56 = arith.addf %55, %54 : vector<8x128xf32>
    %57 = math.tanh %56 : vector<8x128xf32>
    %58 = arith.truncf %57 : vector<8x128xf32> to vector<8x128xbf16>
    %cst_30 = arith.constant dense<0.000000e+00> : vector<8x128xf32>
    %59 = tpu.matmul %58, %42, %cst_30 {dimension_numbers = #tpu.dot_dimension_numbers<[1], [0], [0], [1], [0, 0, 1, 1], [], []>} : vector<8x128xbf16>, vector<128x128xbf16>, vector<8x128xf32> -> vector<8x128xf32>
    %c24_31 = arith.constant 24 : index
    %c0_32 = arith.constant 0 : index
    %60 = vector.load %arg1[%c24_31, %c0_32] : memref<64x128xf32, #tpu.memory_space<vmem>>, vector<8x128xf32>
    %61 = arith.addf %60, %59 : vector<8x128xf32>
    %62 = math.tanh %61 : vector<8x128xf32>
    %63 = arith.truncf %62 : vector<8x128xf32> to vector<8x128xbf16>
    %cst_33 = arith.constant dense<0.000000e+00> : vector<8x128xf32>
    %64 = tpu.matmul %63, %42, %cst_33 {dimension_numbers = #tpu.dot_dimension_numbers<[1], [0], [0], [1], [0, 0, 1, 1], [], []>} : vector<8x128xbf16>, vector<128x128xbf16>, vector<8x128xf32> -> vector<8x128xf32>
    %c32_34 = arith.constant 32 : index
    %c0_35 = arith.constant 0 : index
    %65 = vector.load %arg1[%c32_34, %c0_35] : memref<64x128xf32, #tpu.memory_space<vmem>>, vector<8x128xf32>
    %66 = arith.addf %65, %64 : vector<8x128xf32>
    %67 = math.tanh %66 : vector<8x128xf32>
    %68 = arith.truncf %67 : vector<8x128xf32> to vector<8x128xbf16>
    %cst_36 = arith.constant dense<0.000000e+00> : vector<8x128xf32>
    %69 = tpu.matmul %68, %42, %cst_36 {dimension_numbers = #tpu.dot_dimension_numbers<[1], [0], [0], [1], [0, 0, 1, 1], [], []>} : vector<8x128xbf16>, vector<128x128xbf16>, vector<8x128xf32> -> vector<8x128xf32>
    %c40_37 = arith.constant 40 : index
    %c0_38 = arith.constant 0 : index
    %70 = vector.load %arg1[%c40_37, %c0_38] : memref<64x128xf32, #tpu.memory_space<vmem>>, vector<8x128xf32>
    %71 = arith.addf %70, %69 : vector<8x128xf32>
    %72 = math.tanh %71 : vector<8x128xf32>
    %73 = arith.truncf %72 : vector<8x128xf32> to vector<8x128xbf16>
    %cst_39 = arith.constant dense<0.000000e+00> : vector<8x128xf32>
    %74 = tpu.matmul %73, %42, %cst_39 {dimension_numbers = #tpu.dot_dimension_numbers<[1], [0], [0], [1], [0, 0, 1, 1], [], []>} : vector<8x128xbf16>, vector<128x128xbf16>, vector<8x128xf32> -> vector<8x128xf32>
    %c48_40 = arith.constant 48 : index
    %c0_41 = arith.constant 0 : index
    %75 = vector.load %arg1[%c48_40, %c0_41] : memref<64x128xf32, #tpu.memory_space<vmem>>, vector<8x128xf32>
    %76 = arith.addf %75, %74 : vector<8x128xf32>
    %77 = math.tanh %76 : vector<8x128xf32>
    %78 = arith.truncf %77 : vector<8x128xf32> to vector<8x128xbf16>
    %cst_42 = arith.constant dense<0.000000e+00> : vector<8x128xf32>
    %79 = tpu.matmul %78, %42, %cst_42 {dimension_numbers = #tpu.dot_dimension_numbers<[1], [0], [0], [1], [0, 0, 1, 1], [], []>} : vector<8x128xbf16>, vector<128x128xbf16>, vector<8x128xf32> -> vector<8x128xf32>
    %c56_43 = arith.constant 56 : index
    %c0_44 = arith.constant 0 : index
    %80 = vector.load %arg1[%c56_43, %c0_44] : memref<64x128xf32, #tpu.memory_space<vmem>>, vector<8x128xf32>
    %81 = arith.addf %80, %79 : vector<8x128xf32>
    %82 = math.tanh %81 : vector<8x128xf32>
    %83 = tpu.concatenate %47, %52, %57, %62, %67, %72, %77, %82 in 0 : vector<8x128xf32>, vector<8x128xf32>, vector<8x128xf32>, vector<8x128xf32>, vector<8x128xf32>, vector<8x128xf32>, vector<8x128xf32>, vector<8x128xf32> -> vector<64x128xf32>
    %c0_45 = arith.constant 0 : index
    %c0_46 = arith.constant 0 : index
    %84 = vector.load %arg5[%c0_45, %c0_46] : memref<128x128xf32, #tpu.memory_space<vmem>>, vector<128x128xf32>
    %cst_47 = arith.constant dense<0.000000e+00> : vector<64x128xf32>
    %85 = tpu.matmul %83, %84, %cst_47 {dimension_numbers = #tpu.dot_dimension_numbers<[1], [0], [0], [1], [0, 0, 1, 1], [], []>} : vector<64x128xf32>, vector<128x128xf32>, vector<64x128xf32> -> vector<64x128xf32>
    %c0_48 = arith.constant 0 : index
    %c0_49 = arith.constant 0 : index
    %86 = vector.load %arg6[%c0_48, %c0_49] : memref<1x128xf32, #tpu.memory_space<vmem>>, vector<1x128xf32>
    %87 = vector.broadcast %86 : vector<1x128xf32> to vector<64x128xf32>
    %88 = arith.addf %85, %87 : vector<64x128xf32>
    %c0_50 = arith.constant 0 : index
    %c0_51 = arith.constant 0 : index
    %89 = vector.load %arg7[%c0_50, %c0_51] : memref<64x128xf32, #tpu.memory_space<vmem>>, vector<64x128xf32>
    tpu.vector_store %arg7[%c0_50, %c0_51], %88 {strides = array<i32>} : memref<64x128xf32, #tpu.memory_space<vmem>>, vector<64x128xf32>,
    return
  }
}

</mosaic_0001>

<bundles_post_ra>
// kernel: seq2seq_forward.1
= control target key start
LH: loop header
LB: loop body
LE: loop exit
PB: predicated region body
PF: predicated region fallthrough
CT: control target
= control target key end

     0   :  { %12 = vsyncpa [#allocation3], 0  ;;  %s1669_s24 = smov [#allocation2]   ;;  %s2240_s0 = inlined_call_operand.vmem [shape: f32[64,128], index: 0, kind: input, shape index: {}]   ;;  %s2241_s1 = inlined_call_operand.vmem [shape: f32[64,128], index: 1, kind: input, shape index: {}]   ;;  %s2242_s2 = inlined_call_operand.vmem [shape: f32[8,128], index: 2, kind: input, shape index: {}]   ;;  %s2243_s3 = inlined_call_operand.vmem [shape: bf16[128,128], index: 3, kind: input, shape index: {}]   ;;  %s2244_s4 = inlined_call_operand.vmem [shape: bf16[128,128], index: 4, kind: input, shape index: {}]   ;;  %s2245_s5 = inlined_call_operand.vmem [shape: f32[128,128], index: 5, kind: input, shape index: {}]   ;;  %s2246_s6 = inlined_call_operand.hbm [shape: f32[1,128], index: 6, kind: input, shape index: {}]   ;;  %s2247_s7 = inlined_call_operand.vmem [shape: f32[64,128], index: 7, kind: output, shape index: {}]  }
   0x1   :  { %s31_s25 = sshll.u32 %s1669_s24, 4  ;;  %s1645_s28 = scalar_lea.hbm %s2246_s6, 16  ;;  %s32_s25 = int_to_ptr.vmem [resolvable:$true] %s31_s25 }
   0x2   :  { %p1646_p0 = scmp.ne.s32.totalorder %s2246_s6, %s1645_s28  ;;  %p1649_p1 = scmp.lt.u32.totalorder %s1645_s28, %s2246_s6 }
   0x4   :  { %p1651_p2 = pnand %p1649_p1, %p1646_p0 }
   0x6   :  { %1654 = shalt.err (!%p1651_p2)
}
   0x7   :  { %s1655_s10 = scalar_lea.vmem %s32_s25, 16  ;;  %s1659_s11 = scalar_lea.vmem %s32_s25, 32 }
   0x8   :  { %p1656_p3 = scmp.ne.s32.totalorder %s32_s25, %s1655_s10  ;;  %p1660_p4 = scmp.lt.s32.totalorder %s32_s25, %s32_s25 }
   0x9   :  { %p1661_p5 = scmp.lt.s32.totalorder %s1659_s11, %s1655_s10 }
   0xb   :  { %p1662_p6 = por %p1661_p5, %p1660_p4 }
   0xd   :  { %p1663_p7 = pnand %p1662_p6, %p1656_p3 }
   0xf   :  { %1666 = shalt.err (!%p1663_p7)
}
  0x10   :  { %34 = dma.hbm_to_vmem [thread:$0]  %s2246_s6, 16, %s32_s25, [#allocation3]  }
  0x11   :  { %1667 = dma.done.wait [#allocation3], 16  }
  0x12   :  { %1668 = vsyncadd [#allocation3], 4294967280  ;;  %v1670_v0 = vmov 0.0   ;;  %vm1671_vm0 = vmmov 0   ;;  %v1733_v1 = vld [vmem:[%s2243_s3] sm:$0xff]   ;;  %v1739_v2 = vld [vmem:[%s2243_s3 + $0x8] sm:$0xff]  }
  0x13   :  { %1198 = vmatprep.subr.bf16.mxu1 %v1670_v0  ;;  %1214 = vmatprep.mubr.msk.bf16.mxu1 %vm1671_vm0, %v1670_v0  ;;  %v1748_v3 = vld [vmem:[%s2243_s3 + $0x10] sm:$0xff]   ;;  %v1756_v4 = vld [vmem:[%s2243_s3 + $0x18] sm:$0xff]   ;;  %v1766_v5 = vld [vmem:[%s2243_s3 + $0x20] sm:$0xff]  }
  0x14   :  { %1238 = vmatprep.subr.bf16.mxu0 %v1670_v0  ;;  %1254 = vmatprep.mubr.msk.bf16.mxu0 %vm1671_vm0, %v1670_v0  ;;  %v1775_v6 = vld [vmem:[%s2243_s3 + $0x28] sm:$0xff]   ;;  %v1784_v7 = vld [vmem:[%s2243_s3 + $0x30] sm:$0xff]   ;;  %v1793_v8 = vld [vmem:[%s2243_s3 + $0x38] sm:$0xff]  }
  0x15   :  { %1199 = vmatpush3.bf16.msra.mxu1 %v1733_v1  ;;  %1239 = vmatpush3.bf16.msra.mxu0 %v1733_v1  ;;  %v55_v9 = vld [vmem:[%s2242_s2] sm:$0xff]  ;;  %v189_v19 = vld [vmem:[%s2240_s0 + $0x8] sm:$0xff]  ;;  %v233_v27 = vld [vmem:[%s2240_s0 + $0x10] sm:$0xff] }
  0x16   :  { %1200 = vmatprep.subr.bf16.mxu1 %v1670_v0  ;;  %1240 = vmatprep.subr.bf16.mxu0 %v1670_v0  ;;  %v56_v10 = vpack.c.bf16 %v55_v9, %v55_v9  ;;  %v145_v11 = vld [vmem:[%s2240_s0] sm:$0xff]  ;;  %v277_v35 = vld [vmem:[%s2240_s0 + $0x18] sm:$0xff]  ;;  %v365_v51 = vld [vmem:[%s2240_s0 + $0x28] sm:$0xff] }
  0x17   :  { %v321_v43 = vld [vmem:[%s2240_s0 + $0x20] sm:$0xff]  ;;  %v1942_v60 = vld [vmem:[%s2244_s4 + $0x8] sm:$0xff]   ;;  %v1949_v61 = vld [vmem:[%s2244_s4 + $0x10] sm:$0xff]  }
  0x18   :  { %v1936_v59 = vld [vmem:[%s2244_s4] sm:$0xff]   ;;  %v1956_v62 = vld [vmem:[%s2244_s4 + $0x18] sm:$0xff]   ;;  %v409_v63 = vld [vmem:[%s2240_s0 + $0x30] sm:$0xff] }
  0x19   :  { %1201 = vmatpush3.bf16.msra.mxu1 %v1739_v2  ;;  %1241 = vmatpush3.bf16.msra.mxu0 %v1739_v2  ;;  %v1986_v9 = vld [vmem:[%s2244_s4 + $0x28] sm:$0xff]  }
  0x1a   :  { %1202 = vmatprep.subr.bf16.mxu1 %v1670_v0  ;;  %1242 = vmatprep.subr.bf16.mxu0 %v1670_v0 }
  0x1d   :  { %1203 = vmatpush3.bf16.msra.mxu1 %v1748_v3  ;;  %1243 = vmatpush3.bf16.msra.mxu0 %v1748_v3 }
  0x1e   :  { %1204 = vmatprep.subr.bf16.mxu1 %v1670_v0  ;;  %1244 = vmatprep.subr.bf16.mxu0 %v1670_v0 }
  0x21   :  { %1205 = vmatpush3.bf16.msra.mxu1 %v1756_v4  ;;  %1245 = vmatpush3.bf16.msra.mxu0 %v1756_v4 }
  0x22   :  { %1206 = vmatprep.subr.bf16.mxu1 %v1670_v0  ;;  %1246 = vmatprep.subr.bf16.mxu0 %v1670_v0 }
  0x25   :  { %1207 = vmatpush3.bf16.msra.mxu1 %v1766_v5  ;;  %1247 = vmatpush3.bf16.msra.mxu0 %v1766_v5 }
  0x26   :  { %1208 = vmatprep.subr.bf16.mxu1 %v1670_v0  ;;  %1248 = vmatprep.subr.bf16.mxu0 %v1670_v0 }
  0x29   :  { %1209 = vmatpush3.bf16.msra.mxu1 %v1775_v6  ;;  %1249 = vmatpush3.bf16.msra.mxu0 %v1775_v6 }
  0x2a   :  { %1210 = vmatprep.subr.bf16.mxu1 %v1670_v0  ;;  %1250 = vmatprep.subr.bf16.mxu0 %v1670_v0 }
  0x2d   :  { %1211 = vmatpush3.bf16.msra.mxu1 %v1784_v7  ;;  %1251 = vmatpush3.bf16.msra.mxu0 %v1784_v7 }
  0x2e   :  { %1212 = vmatprep.subr.bf16.mxu1 %v1670_v0  ;;  %1252 = vmatprep.subr.bf16.mxu0 %v1670_v0 }
  0x31   :  { %1213 = vmatpush3.bf16.msra.mxu1 %v1793_v8  ;;  %1253 = vmatpush3.bf16.msra.mxu0 %v1793_v8 }
  0x32   :  { %1218 = vmatprep.subr.bf16.mxu1 %v1670_v0  ;;  %1278 = vmatprep.subr.bf16.mxu0 %v1670_v0 }
  0x34   :  { %1215 = vmatmul.mubr.bf16.vlgmr.msra.gmra.mrb[0].mxu1 %v56_v10  ;;  %v1995_v10 = vld [vmem:[%s2244_s4 + $0x30] sm:$0xff]  }
  0x35   :  { %1219 = vmatpush3.bf16.msra.mxu1 %v1733_v1  ;;  %1234 = vmatprep.mubr.msk.bf16.mxu1 %vm1671_vm0, %v1670_v0 }
  0x36   :  { %1220 = vmatprep.subr.bf16.mxu1 %v1670_v0 }
  0x39   :  { %1221 = vmatpush3.bf16.msra.mxu1 %v1739_v2 }
  0x3a   :  { %1222 = vmatprep.subr.bf16.mxu1 %v1670_v0 }
  0x3d   :  { %1223 = vmatpush3.bf16.msra.mxu1 %v1748_v3 }
  0x3e   :  { %1224 = vmatprep.subr.bf16.mxu1 %v1670_v0 }
  0x41   :  { %1225 = vmatpush3.bf16.msra.mxu1 %v1756_v4 }
  0x42   :  { %1226 = vmatprep.subr.bf16.mxu1 %v1670_v0 }
  0x45   :  { %1227 = vmatpush3.bf16.msra.mxu1 %v1766_v5 }
  0x46   :  { %1228 = vmatprep.subr.bf16.mxu1 %v1670_v0 }
  0x49   :  { %1229 = vmatpush3.bf16.msra.mxu1 %v1775_v6 }
  0x4a   :  { %1230 = vmatprep.subr.bf16.mxu1 %v1670_v0 }
  0x4d   :  { %1231 = vmatpush3.bf16.msra.mxu1 %v1784_v7 }
  0x4e   :  { %1232 = vmatprep.subr.bf16.mxu1 %v1670_v0 }
  0x51   :  { %1233 = vmatpush3.bf16.msra.mxu1 %v1793_v8 }
  0x52   :  { %1258 = vmatprep.subr.bf16.mxu1 %v1670_v0 }
 0x107   :  { %v139_v12 = vpop.f32.mrb[0].mxu1 }
 0x108   :  { %v146_v13 = vadd.f32 %v145_v11, %v139_v12  ;;  %v1216_v14 = vpop.f32.mrb[1].mxu1  ;;  %v2004_v11 = vld [vmem:[%s2244_s4 + $0x38] sm:$0xff]  }
 0x109   :  { %v142_v15 = vpop.f32.mrb[2].mxu1  ;;  %v453_v12 = vld [vmem:[%s2240_s0 + $0x38] sm:$0xff] }
 0x10a   :  { %1613 = vtanh.f32 %v146_v13  ;;  %v1217_v16 = vpop.f32.mrb[3].mxu1 }
 0x114   :  { %v1614_v17 = vpop.eup %1613 }
 0x115   :  { %v148_v18 = vpack.c.bf16 %v1614_v17, %v1614_v17 }
 0x117   :  { %1235 = vmatmul.mubr.bf16.vlgmr.msra.gmra.mrb[4].mxu1 %v148_v18 }
 0x118   :  { %1259 = vmatpush3.bf16.msra.mxu1 %v1733_v1  ;;  %1274 = vmatprep.mubr.msk.bf16.mxu1 %vm1671_vm0, %v1670_v0 }
 0x119   :  { %1260 = vmatprep.subr.bf16.mxu1 %v1670_v0 }
 0x11c   :  { %1261 = vmatpush3.bf16.msra.mxu1 %v1739_v2 }
 0x11d   :  { %1262 = vmatprep.subr.bf16.mxu1 %v1670_v0 }
 0x120   :  { %1263 = vmatpush3.bf16.msra.mxu1 %v1748_v3 }
 0x121   :  { %1264 = vmatprep.subr.bf16.mxu1 %v1670_v0 }
 0x124   :  { %1265 = vmatpush3.bf16.msra.mxu1 %v1756_v4 }
 0x125   :  { %1266 = vmatprep.subr.bf16.mxu1 %v1670_v0 }
 0x128   :  { %1267 = vmatpush3.bf16.msra.mxu1 %v1766_v5 }
 0x129   :  { %1268 = vmatprep.subr.bf16.mxu1 %v1670_v0 }
 0x12c   :  { %1269 = vmatpush3.bf16.msra.mxu1 %v1775_v6 }
 0x12d   :  { %1270 = vmatprep.subr.bf16.mxu1 %v1670_v0 }
 0x130   :  { %1271 = vmatpush3.bf16.msra.mxu1 %v1784_v7 }
 0x131   :  { %1272 = vmatprep.subr.bf16.mxu1 %v1670_v0 }
 0x134   :  { %1273 = vmatpush3.bf16.msra.mxu1 %v1793_v8 }
 0x135   :  { %1298 = vmatprep.subr.bf16.mxu1 %v1670_v0 }
 0x1ea   :  { %v183_v20 = vpop.f32.mrb[4].mxu1 }
 0x1eb   :  { %v190_v21 = vadd.f32 %v189_v19, %v183_v20  ;;  %v1236_v22 = vpop.f32.mrb[5].mxu1  ;;  %v561_v20 = vld [vmem:[%s2241_s1] sm:$0xff] }
 0x1ec   :  { %v186_v23 = vpop.f32.mrb[6].mxu1 }
 0x1ed   :  { %1615 = vtanh.f32 %v190_v21  ;;  %v1237_v24 = vpop.f32.mrb[7].mxu1 }
 0x1f7   :  { %v1616_v25 = vpop.eup %1615 }
 0x1f8   :  { %v192_v26 = vpack.c.bf16 %v1616_v25, %v1616_v25 }
 0x1fa   :  { %1255 = vmatmul.mubr.bf16.vlgmr.msra.gmra.mrb[0].mxu0 %v192_v26 }
 0x1fb   :  { %1279 = vmatpush3.bf16.msra.mxu0 %v1733_v1  ;;  %1294 = vmatprep.mubr.msk.bf16.mxu0 %vm1671_vm0, %v1670_v0 }
 0x1fc   :  { %1280 = vmatprep.subr.bf16.mxu0 %v1670_v0 }
 0x1ff   :  { %1281 = vmatpush3.bf16.msra.mxu0 %v1739_v2 }
 0x200   :  { %1282 = vmatprep.subr.bf16.mxu0 %v1670_v0 }
 0x203   :  { %1283 = vmatpush3.bf16.msra.mxu0 %v1748_v3 }
 0x204   :  { %1284 = vmatprep.subr.bf16.mxu0 %v1670_v0 }
 0x207   :  { %1285 = vmatpush3.bf16.msra.mxu0 %v1756_v4 }
 0x208   :  { %1286 = vmatprep.subr.bf16.mxu0 %v1670_v0 }
 0x20b   :  { %1287 = vmatpush3.bf16.msra.mxu0 %v1766_v5 }
 0x20c   :  { %1288 = vmatprep.subr.bf16.mxu0 %v1670_v0 }
 0x20f   :  { %1289 = vmatpush3.bf16.msra.mxu0 %v1775_v6 }
 0x210   :  { %1290 = vmatprep.subr.bf16.mxu0 %v1670_v0 }
 0x213   :  { %1291 = vmatpush3.bf16.msra.mxu0 %v1784_v7 }
 0x214   :  { %1292 = vmatprep.subr.bf16.mxu0 %v1670_v0 }
 0x217   :  { %1293 = vmatpush3.bf16.msra.mxu0 %v1793_v8 }
 0x218   :  { %1318 = vmatprep.subr.bf16.mxu0 %v1670_v0 }
 0x2cd   :  { %v227_v28 = vpop.f32.mrb[0].mxu0 }
 0x2ce   :  { %v234_v29 = vadd.f32 %v233_v27, %v227_v28  ;;  %v1256_v30 = vpop.f32.mrb[1].mxu0  ;;  %v605_v28 = vld [vmem:[%s2241_s1 + $0x8] sm:$0xff] }
 0x2cf   :  { %v230_v31 = vpop.f32.mrb[2].mxu0 }
 0x2d0   :  { %1617 = vtanh.f32 %v234_v29  ;;  %v1257_v32 = vpop.f32.mrb[3].mxu0 }
 0x2da   :  { %v1618_v33 = vpop.eup %1617 }
 0x2db   :  { %v236_v34 = vpack.c.bf16 %v1618_v33, %v1618_v33 }
 0x2dd   :  { %1275 = vmatmul.mubr.bf16.vlgmr.msra.gmra.mrb[8].mxu1 %v236_v34 }
 0x2de   :  { %1299 = vmatpush3.bf16.msra.mxu1 %v1733_v1  ;;  %1314 = vmatprep.mubr.msk.bf16.mxu1 %vm1671_vm0, %v1670_v0 }
 0x2df   :  { %1300 = vmatprep.subr.bf16.mxu1 %v1670_v0 }
 0x2e2   :  { %1301 = vmatpush3.bf16.msra.mxu1 %v1739_v2 }
 0x2e3   :  { %1302 = vmatprep.subr.bf16.mxu1 %v1670_v0 }
 0x2e6   :  { %1303 = vmatpush3.bf16.msra.mxu1 %v1748_v3 }
 0x2e7   :  { %1304 = vmatprep.subr.bf16.mxu1 %v1670_v0 }
 0x2ea   :  { %1305 = vmatpush3.bf16.msra.mxu1 %v1756_v4 }
 0x2eb   :  { %1306 = vmatprep.subr.bf16.mxu1 %v1670_v0 }
 0x2ee   :  { %1307 = vmatpush3.bf16.msra.mxu1 %v1766_v5 }
 0x2ef   :  { %1308 = vmatprep.subr.bf16.mxu1 %v1670_v0 }
 0x2f2   :  { %1309 = vmatpush3.bf16.msra.mxu1 %v1775_v6 }
 0x2f3   :  { %1310 = vmatprep.subr.bf16.mxu1 %v1670_v0 }
 0x2f6   :  { %1311 = vmatpush3.bf16.msra.mxu1 %v1784_v7 }
 0x2f7   :  { %1312 = vmatprep.subr.bf16.mxu1 %v1670_v0 }
 0x2fa   :  { %1313 = vmatpush3.bf16.msra.mxu1 %v1793_v8 }
 0x2fb   :  { %1338 = vmatprep.subr.bf16.mxu1 %v1670_v0 }
 0x3b0   :  { %v271_v36 = vpop.f32.mrb[8].mxu1 }
 0x3b1   :  { %v278_v37 = vadd.f32 %v277_v35, %v271_v36  ;;  %v1276_v38 = vpop.f32.mrb[9].mxu1  ;;  %v649_v36 = vld [vmem:[%s2241_s1 + $0x10] sm:$0xff] }
 0x3b2   :  { %v274_v39 = vpop.f32.mrb[10].mxu1 }
 0x3b3   :  { %1619 = vtanh.f32 %v278_v37  ;;  %v1277_v40 = vpop.f32.mrb[11].mxu1 }
 0x3bd   :  { %v1620_v41 = vpop.eup %1619 }
 0x3be   :  { %v280_v42 = vpack.c.bf16 %v1620_v41, %v1620_v41 }
 0x3c0   :  { %1295 = vmatmul.mubr.bf16.vlgmr.msra.gmra.mrb[4].mxu0 %v280_v42 }
 0x3c1   :  { %1319 = vmatpush3.bf16.msra.mxu0 %v1733_v1  ;;  %1334 = vmatprep.mubr.msk.bf16.mxu0 %vm1671_vm0, %v1670_v0 }
 0x3c2   :  { %1320 = vmatprep.subr.bf16.mxu0 %v1670_v0 }
 0x3c5   :  { %1321 = vmatpush3.bf16.msra.mxu0 %v1739_v2 }
 0x3c6   :  { %1322 = vmatprep.subr.bf16.mxu0 %v1670_v0 }
 0x3c9   :  { %1323 = vmatpush3.bf16.msra.mxu0 %v1748_v3 }
 0x3ca   :  { %1324 = vmatprep.subr.bf16.mxu0 %v1670_v0 }
 0x3cd   :  { %1325 = vmatpush3.bf16.msra.mxu0 %v1756_v4 }
 0x3ce   :  { %1326 = vmatprep.subr.bf16.mxu0 %v1670_v0 }
 0x3d1   :  { %1327 = vmatpush3.bf16.msra.mxu0 %v1766_v5 }
 0x3d2   :  { %1328 = vmatprep.subr.bf16.mxu0 %v1670_v0 }
 0x3d5   :  { %1329 = vmatpush3.bf16.msra.mxu0 %v1775_v6 }
 0x3d6   :  { %1330 = vmatprep.subr.bf16.mxu0 %v1670_v0 }
 0x3d9   :  { %1331 = vmatpush3.bf16.msra.mxu0 %v1784_v7 }
 0x3da   :  { %1332 = vmatprep.subr.bf16.mxu0 %v1670_v0 }
 0x3dd   :  { %1333 = vmatpush3.bf16.msra.mxu0 %v1793_v8 }
 0x3de   :  { %1358 = vmatprep.subr.bf16.mxu0 %v1670_v0 }
 0x493   :  { %v315_v44 = vpop.f32.mrb[4].mxu0 }
 0x494   :  { %v322_v45 = vadd.f32 %v321_v43, %v315_v44  ;;  %v1296_v46 = vpop.f32.mrb[5].mxu0  ;;  %v693_v44 = vld [vmem:[%s2241_s1 + $0x18] sm:$0xff] }
 0x495   :  { %v318_v47 = vpop.f32.mrb[6].mxu0 }
 0x496   :  { %1621 = vtanh.f32 %v322_v45  ;;  %v1297_v48 = vpop.f32.mrb[7].mxu0 }
 0x4a0   :  { %v1622_v49 = vpop.eup %1621 }
 0x4a1   :  { %v324_v50 = vpack.c.bf16 %v1622_v49, %v1622_v49 }
 0x4a3   :  { %1315 = vmatmul.mubr.bf16.vlgmr.msra.gmra.mrb[12].mxu1 %v324_v50 }
 0x4a4   :  { %1339 = vmatpush3.bf16.msra.mxu1 %v1733_v1  ;;  %1354 = vmatprep.mubr.msk.bf16.mxu1 %vm1671_vm0, %v1670_v0 }
 0x4a5   :  { %1340 = vmatprep.subr.bf16.mxu1 %v1670_v0 }
 0x4a8   :  { %1341 = vmatpush3.bf16.msra.mxu1 %v1739_v2 }
 0x4a9   :  { %1342 = vmatprep.subr.bf16.mxu1 %v1670_v0 }
 0x4ac   :  { %1343 = vmatpush3.bf16.msra.mxu1 %v1748_v3 }
 0x4ad   :  { %1344 = vmatprep.subr.bf16.mxu1 %v1670_v0 }
 0x4b0   :  { %1345 = vmatpush3.bf16.msra.mxu1 %v1756_v4 }
 0x4b1   :  { %1346 = vmatprep.subr.bf16.mxu1 %v1670_v0 }
 0x4b4   :  { %1347 = vmatpush3.bf16.msra.mxu1 %v1766_v5 }
 0x4b5   :  { %1348 = vmatprep.subr.bf16.mxu1 %v1670_v0 }
 0x4b8   :  { %1349 = vmatpush3.bf16.msra.mxu1 %v1775_v6 }
 0x4b9   :  { %1350 = vmatprep.subr.bf16.mxu1 %v1670_v0 }
 0x4bc   :  { %1351 = vmatpush3.bf16.msra.mxu1 %v1784_v7 }
 0x4bd   :  { %1352 = vmatprep.subr.bf16.mxu1 %v1670_v0 }
 0x4c0   :  { %1353 = vmatpush3.bf16.msra.mxu1 %v1793_v8  ;;  %v1977_v8 = vld [vmem:[%s2244_s4 + $0x20] sm:$0xff]  }
 0x4c1   :  { %1378 = vmatprep.subr.bf16.mxu1 %v1670_v0 }
 0x576   :  { %v359_v52 = vpop.f32.mrb[12].mxu1 }
 0x577   :  { %v366_v53 = vadd.f32 %v365_v51, %v359_v52  ;;  %v1316_v54 = vpop.f32.mrb[13].mxu1  ;;  %v737_v52 = vld [vmem:[%s2241_s1 + $0x20] sm:$0xff] }
 0x578   :  { %v362_v55 = vpop.f32.mrb[14].mxu1 }
 0x579   :  { %1623 = vtanh.f32 %v366_v53  ;;  %v1317_v56 = vpop.f32.mrb[15].mxu1 }
 0x583   :  { %v1624_v57 = vpop.eup %1623 }
 0x584   :  { %v368_v58 = vpack.c.bf16 %v1624_v57, %v1624_v57 }
 0x586   :  { %1335 = vmatmul.mubr.bf16.vlgmr.msra.gmra.mrb[8].mxu0 %v368_v58 }
 0x587   :  { %1374 = vmatprep.mubr.msk.bf16.mxu0 %vm1671_vm0, %v1670_v0  ;;  %1359 = vmatpush3.bf16.msra.mxu0 %v1936_v59 }
 0x588   :  { %1360 = vmatprep.subr.bf16.mxu0 %v1670_v0 }
 0x58b   :  { %1361 = vmatpush3.bf16.msra.mxu0 %v1942_v60 }
 0x58c   :  { %1362 = vmatprep.subr.bf16.mxu0 %v1670_v0 }
 0x58f   :  { %1363 = vmatpush3.bf16.msra.mxu0 %v1949_v61 }
 0x590   :  { %1364 = vmatprep.subr.bf16.mxu0 %v1670_v0 }
 0x593   :  { %1365 = vmatpush3.bf16.msra.mxu0 %v1956_v62 }
 0x594   :  { %1366 = vmatprep.subr.bf16.mxu0 %v1670_v0 }
 0x597   :  { %1367 = vmatpush3.bf16.msra.mxu0 %v1977_v8 }
 0x598   :  { %1368 = vmatprep.subr.bf16.mxu0 %v1670_v0 }
 0x59b   :  { %1369 = vmatpush3.bf16.msra.mxu0 %v1986_v9 }
 0x59c   :  { %1370 = vmatprep.subr.bf16.mxu0 %v1670_v0 }
 0x59f   :  { %1371 = vmatpush3.bf16.msra.mxu0 %v1995_v10 }
 0x5a0   :  { %1372 = vmatprep.subr.bf16.mxu0 %v1670_v0 }
 0x5a3   :  { %1373 = vmatpush3.bf16.msra.mxu0 %v2004_v11 }
 0x5a4   :  { %1398 = vmatprep.subr.bf16.mxu0 %v1670_v0 }
 0x659   :  { %v403_v1 = vpop.f32.mrb[8].mxu0 }
 0x65a   :  { %v410_v2 = vadd.f32 %v409_v63, %v403_v1  ;;  %v1336_v3 = vpop.f32.mrb[9].mxu0 }
 0x65b   :  { %v406_v4 = vpop.f32.mrb[10].mxu0 }
 0x65c   :  { %1625 = vtanh.f32 %v410_v2  ;;  %v1337_v5 = vpop.f32.mrb[11].mxu0 }
 0x65d   :  { %v874_v5 = vld [vmem:[%s2245_s5 + $0x10] sm:$0xff] }
 0x666   :  { %v1626_v6 = vpop.eup %1625 }
 0x667   :  { %v412_v7 = vpack.c.bf16 %v1626_v6, %v1626_v6  ;;  %v875_v6 = vld [vmem:[%s2245_s5 + $0x18] sm:$0xff] }
 0x669   :  { %1355 = vmatmul.mubr.bf16.vlgmr.msra.gmra.mrb[16].mxu1 %v412_v7 }
 0x66a   :  { %1379 = vmatpush3.bf16.msra.mxu1 %v1936_v59  ;;  %1394 = vmatprep.mubr.msk.bf16.mxu1 %vm1671_vm0, %v1670_v0 }
 0x66b   :  { %1380 = vmatprep.subr.bf16.mxu1 %v1670_v0 }
 0x66e   :  { %1381 = vmatpush3.bf16.msra.mxu1 %v1942_v60 }
 0x66f   :  { %1382 = vmatprep.subr.bf16.mxu1 %v1670_v0 }
 0x672   :  { %1383 = vmatpush3.bf16.msra.mxu1 %v1949_v61 }
 0x673   :  { %1384 = vmatprep.subr.bf16.mxu1 %v1670_v0 }
 0x676   :  { %1385 = vmatpush3.bf16.msra.mxu1 %v1956_v62 }
 0x677   :  { %1386 = vmatprep.subr.bf16.mxu1 %v1670_v0 }
 0x67a   :  { %1387 = vmatpush3.bf16.msra.mxu1 %v1977_v8 }
 0x67b   :  { %1388 = vmatprep.subr.bf16.mxu1 %v1670_v0 }
 0x67e   :  { %1389 = vmatpush3.bf16.msra.mxu1 %v1986_v9 }
 0x67f   :  { %1390 = vmatprep.subr.bf16.mxu1 %v1670_v0 }
 0x682   :  { %1391 = vmatpush3.bf16.msra.mxu1 %v1995_v10 }
 0x683   :  { %1392 = vmatprep.subr.bf16.mxu1 %v1670_v0 }
 0x686   :  { %1393 = vmatpush3.bf16.msra.mxu1 %v2004_v11 }
 0x687   :  { %1418 = vmatprep.subr.bf16.mxu1 %v1670_v0 }
 0x73c   :  { %v447_v13 = vpop.f32.mrb[16].mxu1 }
 0x73d   :  { %v454_v14 = vadd.f32 %v453_v12, %v447_v13  ;;  %v1356_v15 = vpop.f32.mrb[17].mxu1  ;;  %v878_v13 = vld [vmem:[%s2245_s5 + $0x30] sm:$0xff] }
 0x73e   :  { %v450_v16 = vpop.f32.mrb[18].mxu1 }
 0x73f   :  { %1627 = vtanh.f32 %v454_v14  ;;  %v1357_v17 = vpop.f32.mrb[19].mxu1  ;;  %v879_v14 = vld [vmem:[%s2245_s5 + $0x38] sm:$0xff]  ;;  %v880_v16 = vld [vmem:[%s2245_s5 + $0x40] sm:$0xff] }
 0x740   :  { %v1574_v15 = vpack.c.bf16 %v879_v14, %v878_v13  ;;  %v881_v17 = vld [vmem:[%s2245_s5 + $0x48] sm:$0xff] }
 0x749   :  { %v1628_v18 = vpop.eup %1627 }
 0x74a   :  { %v472_v19 = vpack.c.bf16 %v1628_v18, %v1628_v18  ;;  %v1578_v18 = vpack.c.bf16 %v881_v17, %v880_v16 }
 0x74c   :  { %1375 = vmatmul.mubr.bf16.vlgmr.msra.gmra.mrb[12].mxu0 %v472_v19  ;;  %v882_v19 = vld [vmem:[%s2245_s5 + $0x50] sm:$0xff] }
 0x74d   :  { %1399 = vmatpush3.bf16.msra.mxu0 %v1936_v59  ;;  %1414 = vmatprep.mubr.msk.bf16.mxu0 %vm1671_vm0, %v1670_v0 }
 0x74e   :  { %1400 = vmatprep.subr.bf16.mxu0 %v1670_v0 }
 0x751   :  { %1401 = vmatpush3.bf16.msra.mxu0 %v1942_v60 }
 0x752   :  { %1402 = vmatprep.subr.bf16.mxu0 %v1670_v0 }
 0x755   :  { %1403 = vmatpush3.bf16.msra.mxu0 %v1949_v61 }
 0x756   :  { %1404 = vmatprep.subr.bf16.mxu0 %v1670_v0 }
 0x759   :  { %1405 = vmatpush3.bf16.msra.mxu0 %v1956_v62 }
 0x75a   :  { %1406 = vmatprep.subr.bf16.mxu0 %v1670_v0 }
 0x75d   :  { %1407 = vmatpush3.bf16.msra.mxu0 %v1977_v8 }
 0x75e   :  { %1408 = vmatprep.subr.bf16.mxu0 %v1670_v0 }
 0x761   :  { %1409 = vmatpush3.bf16.msra.mxu0 %v1986_v9 }
 0x762   :  { %1410 = vmatprep.subr.bf16.mxu0 %v1670_v0 }
 0x765   :  { %1411 = vmatpush3.bf16.msra.mxu0 %v1995_v10 }
 0x766   :  { %1412 = vmatprep.subr.bf16.mxu0 %v1670_v0 }
 0x769   :  { %1413 = vmatpush3.bf16.msra.mxu0 %v2004_v11 }
 0x76a   :  { %1438 = vmatprep.subr.bf16.mxu0 %v1670_v0 }
 0x81f   :  { %v555_v21 = vpop.f32.mrb[12].mxu0 }
 0x820   :  { %v562_v22 = vadd.f32 %v561_v20, %v555_v21  ;;  %v1376_v23 = vpop.f32.mrb[13].mxu0  ;;  %v883_v20 = vld [vmem:[%s2245_s5 + $0x58] sm:$0xff] }
 0x821   :  { %v558_v24 = vpop.f32.mrb[14].mxu0  ;;  %v1582_v21 = vpack.c.bf16 %v883_v20, %v882_v19  ;;  %v885_v23 = vld [vmem:[%s2245_s5 + $0x68] sm:$0xff] }
 0x822   :  { %1629 = vtanh.f32 %v562_v22  ;;  %v1377_v25 = vpop.f32.mrb[15].mxu0  ;;  %v884_v22 = vld [vmem:[%s2245_s5 + $0x60] sm:$0xff] }
 0x823   :  { %v1586_v24 = vpack.c.bf16 %v885_v23, %v884_v22  ;;  %v886_v25 = vld [vmem:[%s2245_s5 + $0x70] sm:$0xff] }
 0x82c   :  { %v2034_v26 = vpop.eup %1629 }
 0x82d   :  { %v564_v27 = vpack.c.bf16 %v2034_v26, %v2034_v26 }
 0x82f   :  { %1395 = vmatmul.mubr.bf16.vlgmr.msra.gmra.mrb[20].mxu1 %v564_v27 }
 0x830   :  { %1419 = vmatpush3.bf16.msra.mxu1 %v1936_v59  ;;  %1434 = vmatprep.mubr.msk.bf16.mxu1 %vm1671_vm0, %v1670_v0 }
 0x831   :  { %1420 = vmatprep.subr.bf16.mxu1 %v1670_v0 }
 0x834   :  { %1421 = vmatpush3.bf16.msra.mxu1 %v1942_v60 }
 0x835   :  { %1422 = vmatprep.subr.bf16.mxu1 %v1670_v0 }
 0x838   :  { %1423 = vmatpush3.bf16.msra.mxu1 %v1949_v61 }
 0x839   :  { %1424 = vmatprep.subr.bf16.mxu1 %v1670_v0 }
 0x83c   :  { %1425 = vmatpush3.bf16.msra.mxu1 %v1956_v62 }
 0x83d   :  { %1426 = vmatprep.subr.bf16.mxu1 %v1670_v0 }
 0x840   :  { %1427 = vmatpush3.bf16.msra.mxu1 %v1977_v8 }
 0x841   :  { %1428 = vmatprep.subr.bf16.mxu1 %v1670_v0 }
 0x844   :  { %1429 = vmatpush3.bf16.msra.mxu1 %v1986_v9 }
 0x845   :  { %1430 = vmatprep.subr.bf16.mxu1 %v1670_v0 }
 0x848   :  { %1431 = vmatpush3.bf16.msra.mxu1 %v1995_v10 }
 0x849   :  { %1432 = vmatprep.subr.bf16.mxu1 %v1670_v0 }
 0x84c   :  { %1433 = vmatpush3.bf16.msra.mxu1 %v2004_v11 }
 0x84d   :  { %1458 = vmatprep.subr.bf16.mxu1 %v1670_v0 }
 0x902   :  { %v599_v29 = vpop.f32.mrb[20].mxu1 }
 0x903   :  { %v606_v30 = vadd.f32 %v605_v28, %v599_v29  ;;  %v1396_v31 = vpop.f32.mrb[21].mxu1  ;;  %v825_v28 = vld [vmem:[%s2241_s1 + $0x30] sm:$0xff] }
 0x904   :  { %v602_v32 = vpop.f32.mrb[22].mxu1 }
 0x905   :  { %1631 = vtanh.f32 %v606_v30  ;;  %v1397_v33 = vpop.f32.mrb[23].mxu1 }
 0x90f   :  { %v2059_v34 = vpop.eup %1631 }
 0x910   :  { %v608_v35 = vpack.c.bf16 %v2059_v34, %v2059_v34 }
 0x912   :  { %1415 = vmatmul.mubr.bf16.vlgmr.msra.gmra.mrb[16].mxu0 %v608_v35 }
 0x913   :  { %1439 = vmatpush3.bf16.msra.mxu0 %v1936_v59  ;;  %1454 = vmatprep.mubr.msk.bf16.mxu0 %vm1671_vm0, %v1670_v0 }
 0x914   :  { %1440 = vmatprep.subr.bf16.mxu0 %v1670_v0 }
 0x917   :  { %1441 = vmatpush3.bf16.msra.mxu0 %v1942_v60 }
 0x918   :  { %1442 = vmatprep.subr.bf16.mxu0 %v1670_v0 }
 0x91b   :  { %1443 = vmatpush3.bf16.msra.mxu0 %v1949_v61 }
 0x91c   :  { %1444 = vmatprep.subr.bf16.mxu0 %v1670_v0 }
 0x91f   :  { %1445 = vmatpush3.bf16.msra.mxu0 %v1956_v62 }
 0x920   :  { %1446 = vmatprep.subr.bf16.mxu0 %v1670_v0 }
 0x923   :  { %1447 = vmatpush3.bf16.msra.mxu0 %v1977_v8 }
 0x924   :  { %1448 = vmatprep.subr.bf16.mxu0 %v1670_v0 }
 0x927   :  { %1449 = vmatpush3.bf16.msra.mxu0 %v1986_v9 }
 0x928   :  { %1450 = vmatprep.subr.bf16.mxu0 %v1670_v0 }
 0x92b   :  { %1451 = vmatpush3.bf16.msra.mxu0 %v1995_v10 }
 0x92c   :  { %1452 = vmatprep.subr.bf16.mxu0 %v1670_v0 }
 0x92f   :  { %1453 = vmatpush3.bf16.msra.mxu0 %v2004_v11 }
 0x930   :  { %1478 = vmatprep.subr.bf16.mxu0 %v1670_v0 }
 0x9e5   :  { %v643_v37 = vpop.f32.mrb[16].mxu0 }
 0x9e6   :  { %v650_v38 = vadd.f32 %v649_v36, %v643_v37  ;;  %v1416_v39 = vpop.f32.mrb[17].mxu0  ;;  %v1029_v36 = vld [vmem:[#allocation2] ss:$0 sm:$0xff] }
 0x9e7   :  { %v646_v40 = vpop.f32.mrb[18].mxu0 }
 0x9e8   :  { %1633 = vtanh.f32 %v650_v38  ;;  %v1417_v41 = vpop.f32.mrb[19].mxu0 }
 0x9f2   :  { %v2084_v42 = vpop.eup %1633 }
 0x9f3   :  { %v652_v43 = vpack.c.bf16 %v2084_v42, %v2084_v42 }
 0x9f5   :  { %1435 = vmatmul.mubr.bf16.vlgmr.msra.gmra.mrb[24].mxu1 %v652_v43 }
 0x9f6   :  { %1459 = vmatpush3.bf16.msra.mxu1 %v1936_v59  ;;  %1474 = vmatprep.mubr.msk.bf16.mxu1 %vm1671_vm0, %v1670_v0 }
 0x9f7   :  { %1460 = vmatprep.subr.bf16.mxu1 %v1670_v0 }
 0x9fa   :  { %1461 = vmatpush3.bf16.msra.mxu1 %v1942_v60 }
 0x9fb   :  { %1462 = vmatprep.subr.bf16.mxu1 %v1670_v0 }
 0x9fe   :  { %1463 = vmatpush3.bf16.msra.mxu1 %v1949_v61 }
 0x9ff   :  { %1464 = vmatprep.subr.bf16.mxu1 %v1670_v0 }
 0xa02   :  { %1465 = vmatpush3.bf16.msra.mxu1 %v1956_v62 }
 0xa03   :  { %1466 = vmatprep.subr.bf16.mxu1 %v1670_v0 }
 0xa06   :  { %1467 = vmatpush3.bf16.msra.mxu1 %v1977_v8 }
 0xa07   :  { %1468 = vmatprep.subr.bf16.mxu1 %v1670_v0 }
 0xa0a   :  { %1469 = vmatpush3.bf16.msra.mxu1 %v1986_v9 }
 0xa0b   :  { %1470 = vmatprep.subr.bf16.mxu1 %v1670_v0 }
 0xa0e   :  { %1471 = vmatpush3.bf16.msra.mxu1 %v1995_v10 }
 0xa0f   :  { %1472 = vmatprep.subr.bf16.mxu1 %v1670_v0 }
 0xa12   :  { %1473 = vmatpush3.bf16.msra.mxu1 %v2004_v11 }
 0xa13   :  { %1498 = vmatprep.subr.bf16.mxu1 %v1670_v0 }
 0xac8   :  { %v687_v45 = vpop.f32.mrb[24].mxu1 }
 0xac9   :  { %v694_v46 = vadd.f32 %v693_v44, %v687_v45  ;;  %v1436_v47 = vpop.f32.mrb[25].mxu1 }
 0xaca   :  { %v690_v48 = vpop.f32.mrb[26].mxu1 }
 0xacb   :  { %1635 = vtanh.f32 %v694_v46  ;;  %v1437_v49 = vpop.f32.mrb[27].mxu1 }
 0xacc   :  { %v869_v49 = vld [vmem:[%s2241_s1 + $0x38] sm:$0xff] }
 0xad5   :  { %v2109_v50 = vpop.eup %1635 }
 0xad6   :  { %v696_v51 = vpack.c.bf16 %v2109_v50, %v2109_v50 }
 0xad8   :  { %1455 = vmatmul.mubr.bf16.vlgmr.msra.gmra.mrb[20].mxu0 %v696_v51 }
 0xad9   :  { %1479 = vmatpush3.bf16.msra.mxu0 %v1936_v59  ;;  %1494 = vmatprep.mubr.msk.bf16.mxu0 %vm1671_vm0, %v1670_v0 }
 0xada   :  { %1480 = vmatprep.subr.bf16.mxu0 %v1670_v0 }
 0xadd   :  { %1481 = vmatpush3.bf16.msra.mxu0 %v1942_v60 }
 0xade   :  { %1482 = vmatprep.subr.bf16.mxu0 %v1670_v0 }
 0xae1   :  { %1483 = vmatpush3.bf16.msra.mxu0 %v1949_v61 }
 0xae2   :  { %1484 = vmatprep.subr.bf16.mxu0 %v1670_v0 }
 0xae5   :  { %1485 = vmatpush3.bf16.msra.mxu0 %v1956_v62 }
 0xae6   :  { %1486 = vmatprep.subr.bf16.mxu0 %v1670_v0 }
 0xae9   :  { %1487 = vmatpush3.bf16.msra.mxu0 %v1977_v8 }
 0xaea   :  { %1488 = vmatprep.subr.bf16.mxu0 %v1670_v0 }
 0xaed   :  { %1489 = vmatpush3.bf16.msra.mxu0 %v1986_v9 }
 0xaee   :  { %1490 = vmatprep.subr.bf16.mxu0 %v1670_v0 }
 0xaf1   :  { %1491 = vmatpush3.bf16.msra.mxu0 %v1995_v10 }
 0xaf2   :  { %1492 = vmatprep.subr.bf16.mxu0 %v1670_v0 }
 0xaf5   :  { %1493 = vmatpush3.bf16.msra.mxu0 %v2004_v11 }
 0xbab   :  { %v731_v53 = vpop.f32.mrb[20].mxu0 }
 0xbac   :  { %v738_v54 = vadd.f32 %v737_v52, %v731_v53  ;;  %v1456_v55 = vpop.f32.mrb[21].mxu0 }
 0xbad   :  { %v734_v56 = vpop.f32.mrb[22].mxu0 }
 0xbae   :  { %1637 = vtanh.f32 %v738_v54  ;;  %v1457_v57 = vpop.f32.mrb[23].mxu0 }
 0xbb8   :  { %v2133_v58 = vpop.eup %1637 }
 0xbb9   :  { %v740_v63 = vpack.c.bf16 %v2133_v58, %v2133_v58 }
 0xbbb   :  { %1475 = vmatmul.mubr.bf16.vlgmr.msra.gmra.mrb[28].mxu1 %v740_v63 }
 0xbbc   :  { %1499 = vmatpush3.bf16.msra.mxu1 %v1936_v59  ;;  %1514 = vmatprep.mubr.msk.bf16.mxu1 %vm1671_vm0, %v1670_v0  ;;  %v872_v59 = vld [vmem:[%s2245_s5] sm:$0xff] }
 0xbbd   :  { %1500 = vmatprep.subr.bf16.mxu1 %v1670_v0 }
 0xbc0   :  { %1501 = vmatpush3.bf16.msra.mxu1 %v1942_v60  ;;  %v873_v60 = vld [vmem:[%s2245_s5 + $0x8] sm:$0xff] }
 0xbc1   :  { %1502 = vmatprep.subr.bf16.mxu1 %v1670_v0 }
 0xbc4   :  { %1503 = vmatpush3.bf16.msra.mxu1 %v1949_v61  ;;  %v1562_v61 = vpack.c.bf16 %v873_v60, %v872_v59 }
 0xbc5   :  { %1504 = vmatprep.subr.bf16.mxu1 %v1670_v0 }
 0xbc6   :  { %1563 = vmatprep.subr.bf16.mxu0 %v1562_v61 }
 0xbc8   :  { %1505 = vmatpush3.bf16.msra.mxu1 %v1956_v62  ;;  %v781_v62 = vld [vmem:[%s2241_s1 + $0x28] sm:$0xff] }
 0xbc9   :  { %1506 = vmatprep.subr.bf16.mxu1 %v1670_v0 }
 0xbcc   :  { %1507 = vmatpush3.bf16.msra.mxu1 %v1977_v8 }
 0xbcd   :  { %1508 = vmatprep.subr.bf16.mxu1 %v1670_v0 }
 0xbd0   :  { %1509 = vmatpush3.bf16.msra.mxu1 %v1986_v9  ;;  %v1566_v9 = vpack.c.bf16 %v875_v6, %v874_v5 }
 0xbd1   :  { %1510 = vmatprep.subr.bf16.mxu1 %v1670_v0 }
 0xbd4   :  { %1511 = vmatpush3.bf16.msra.mxu1 %v1995_v10  ;;  %v876_v10 = vld [vmem:[%s2245_s5 + $0x20] sm:$0xff] }
 0xbd5   :  { %1512 = vmatprep.subr.bf16.mxu1 %v1670_v0 }
 0xbd8   :  { %1513 = vmatpush3.bf16.msra.mxu1 %v2004_v11  ;;  %v877_v11 = vld [vmem:[%s2245_s5 + $0x28] sm:$0xff] }
 0xbd9   :  { %v1570_v12 = vpack.c.bf16 %v877_v11, %v876_v10 }
 0xc8e   :  { %v775_v1 = vpop.f32.mrb[28].mxu1 }
 0xc8f   :  { %v782_v2 = vadd.f32 %v781_v62, %v775_v1  ;;  %v1476_v3 = vpop.f32.mrb[29].mxu1 }
 0xc90   :  { %v778_v0 = vpop.f32.mrb[30].mxu1 }
 0xc91   :  { %1639 = vtanh.f32 %v782_v2  ;;  %v1477_v4 = vpop.f32.mrb[31].mxu1 }
 0xc9b   :  { %v1640_v7 = vpop.eup %1639 }
 0xc9c   :  { %v784_v8 = vpack.c.bf16 %v1640_v7, %v1640_v7 }
 0xc9e   :  { %1495 = vmatmul.mubr.bf16.vlgmr.msra.gmra.mrb[24].mxu0 %v784_v8 }
 0xc9f   :  { %1565 = vmatpush3.bf16.msra.mxu0 %v1562_v61  ;;  %1550 = vmatprep.mubr.f32.mxu0 %v2034_v26  ;;  %v887_v26 = vld [vmem:[%s2245_s5 + $0x78] sm:$0xff] }
 0xca0   :  { %1567 = vmatprep.subr.bf16.mxu0 %v1566_v9  ;;  %v1590_v27 = vpack.c.bf16 %v887_v26, %v886_v25 }
 0xca3   :  { %1569 = vmatpush3.bf16.msra.mxu0 %v1566_v9 }
 0xca4   :  { %1571 = vmatprep.subr.bf16.mxu0 %v1570_v12 }
 0xca7   :  { %1573 = vmatpush3.bf16.msra.mxu0 %v1570_v12 }
 0xca8   :  { %1575 = vmatprep.subr.bf16.mxu0 %v1574_v15 }
 0xcab   :  { %1577 = vmatpush3.bf16.msra.mxu0 %v1574_v15 }
 0xcac   :  { %1579 = vmatprep.subr.bf16.mxu0 %v1578_v18 }
 0xcaf   :  { %1581 = vmatpush3.bf16.msra.mxu0 %v1578_v18 }
 0xcb0   :  { %1583 = vmatprep.subr.bf16.mxu0 %v1582_v21 }
 0xcb3   :  { %1585 = vmatpush3.bf16.msra.mxu0 %v1582_v21 }
 0xcb4   :  { %1587 = vmatprep.subr.bf16.mxu0 %v1586_v24 }
 0xcb7   :  { %1589 = vmatpush3.bf16.msra.mxu0 %v1586_v24 }
 0xcb8   :  { %1591 = vmatprep.subr.bf16.mxu0 %v1590_v27 }
 0xcbb   :  { %1593 = vmatpush3.bf16.msra.mxu0 %v1590_v27 }
 0xcbe   :  { %1551 = vmatmul.mubr.f32.vlgmr.msra.gmra.mrb[28].mxu0 %v2059_v34 }
 0xcbf   :  { %1553 = vmatprep.mubr.f32.mxu0 %v2084_v42 }
 0xcc2   :  { %1554 = vmatmul.mubr.f32.gmra.mrb[30].mxu0 %v2109_v50 }
 0xcc3   :  { %1556 = vmatprep.mubr.f32.mxu0 %v2133_v58 }
 0xcc6   :  { %1557 = vmatmul.mubr.f32.gmra.mrb[32].mxu0 %v1640_v7 }
 0xd71   :  { %v819_v29 = vpop.f32.mrb[24].mxu0 }
 0xd72   :  { %v826_v30 = vadd.f32 %v825_v28, %v819_v29  ;;  %v1496_v31 = vpop.f32.mrb[25].mxu0 }
 0xd73   :  { %v822_v32 = vpop.f32.mrb[26].mxu0 }
 0xd74   :  { %1641 = vtanh.f32 %v826_v30  ;;  %v1497_v33 = vpop.f32.mrb[27].mxu0 }
 0xd7e   :  { %v1642_v35 = vpop.eup %1641 }
 0xd7f   :  { %1559 = vmatprep.mubr.f32.mxu0 %v1642_v35  ;;  %v828_v34 = vpack.c.bf16 %v1642_v35, %v1642_v35 }
 0xd81   :  { %1515 = vmatmul.mubr.bf16.vlgmr.msra.gmra.mrb[32].mxu1 %v828_v34 }
 0xd91   :  { %v1552_v37 = vpop.f32.mrb[28].mxu0 }
 0xd92   :  { %v967_v38 = vadd.f32 %v1552_v37, %v1029_v36  ;;  %v961_v39 = vpop.f32.mrb[29].mxu0 }
 0xd93   :  { %v962_v40 = vadd.f32 %v1029_v36, %v961_v39 }
 0xd94   :  { %1001 = vst [vmem:[%s2247_s7 + $0x8] sm:$0xff] %v967_v38 }
 0xd95   :  { %1000 = vst [vmem:[%s2247_s7] sm:$0xff] %v962_v40  ;;  %v1555_v41 = vpop.f32.mrb[30].mxu0 }
 0xd96   :  { %v977_v42 = vadd.f32 %v1555_v41, %v1029_v36  ;;  %v971_v43 = vpop.f32.mrb[31].mxu0 }
 0xd97   :  { %v972_v44 = vadd.f32 %v1029_v36, %v971_v43 }
 0xd98   :  { %1003 = vst [vmem:[%s2247_s7 + $0x18] sm:$0xff] %v977_v42 }
 0xd99   :  { %1002 = vst [vmem:[%s2247_s7 + $0x10] sm:$0xff] %v972_v44  ;;  %v1558_v45 = vpop.f32.mrb[32].mxu0 }
 0xd9a   :  { %v987_v46 = vadd.f32 %v1558_v45, %v1029_v36  ;;  %v981_v47 = vpop.f32.mrb[33].mxu0 }
 0xd9b   :  { %v982_v48 = vadd.f32 %v1029_v36, %v981_v47 }
 0xd9c   :  { %1005 = vst [vmem:[%s2247_s7 + $0x28] sm:$0xff] %v987_v46 }
 0xd9d   :  { %1004 = vst [vmem:[%s2247_s7 + $0x20] sm:$0xff] %v982_v48 }
 0xe54   :  { %v863_v50 = vpop.f32.mrb[32].mxu1 }
 0xe55   :  { %v870_v51 = vadd.f32 %v869_v49, %v863_v50  ;;  %v1516_v52 = vpop.f32.mrb[33].mxu1 }
 0xe56   :  { %v866_v53 = vpop.f32.mrb[34].mxu1 }
 0xe57   :  { %1643 = vtanh.f32 %v870_v51  ;;  %v1517_v54 = vpop.f32.mrb[35].mxu1 }
 0xe61   :  { %v1644_v55 = vpop.eup %1643 }
 0xe62   :  { %1560 = vmatmul.mubr.f32.gmra.mrb[34].mxu0 %v1644_v55 }
 0xf35   :  { %v1561_v56 = vpop.f32.mrb[34].mxu0 }
 0xf36   :  { %v997_v57 = vadd.f32 %v1561_v56, %v1029_v36  ;;  %v991_v58 = vpop.f32.mrb[35].mxu0 }
 0xf37   :  { %v992_v63 = vadd.f32 %v1029_v36, %v991_v58 }
 0xf38   :  { %1007 = vst [vmem:[%s2247_s7 + $0x38] sm:$0xff] %v997_v57 }
 0xf39   :  { %1006 = vst [vmem:[%s2247_s7 + $0x30] sm:$0xff] %v992_v63 }
 0xf3a   :  { %1012 = vsyncpa [#allocation3], 1 }

</bundles_post_ra>
